<compile_context>
chip_gen: v5e
topology: v5e:2x2
jax: 0.10.0
libtpu: 0.0.40
codegen_flags: <defaults>
</compile_context>

<pallas_src>
import functools

import jax
import jax.numpy as jnp
from jax.experimental import pallas as pl
from jax.experimental.pallas import tpu as pltpu

EPS = 1e-5
OUT_PAD = 128  # lane-dense packed output width (>= output_size + 1)


def fnet_kernel(
    x_ref,                                    # (B, K_pad) f32 input, K padded to 8
    w1_ref, p1_ref,                           # fc1 weight (K_pad, H); packed [b1; g1; be1] (3, H)
    rw1_ref, rb1_ref, rw2_ref, rb2_ref,       # stacked residual blocks (R, H, H) / (R, 1, H)
    wt_ref, pt_ref,                           # fused fc5||fc6 tail (H, OUT_PAD); packed [bt; gt; bet] (3, OUT_PAD)
    out_ref,                                  # packed (B, OUT_PAD) output slab
    *, output_size,
):
    x = x_ref[...]
    inv_b = 1.0 / x.shape[0]                  # static

    b1 = p1_ref[0:1, :]                       # static slices, no runtime cost
    g1 = p1_ref[1:2, :]
    be1 = p1_ref[2:3, :]

    # ---- fc1 -> BatchNorm1d (train) -> ReLU; single-pass BN, folded scale/shift
    h = jnp.dot(x, w1_ref[...], preferred_element_type=jnp.float32) + b1
    s = jnp.sum(h, axis=0, keepdims=True)
    ss = jnp.sum(h * h, axis=0, keepdims=True)
    mu = s * inv_b
    var = ss * inv_b - mu * mu                # biased batch variance
    scale = g1 * jax.lax.rsqrt(var + EPS)
    shift = be1 - mu * scale
    h = jnp.maximum(h * scale + shift, 0.0)

    # ---- residual MLP blocks: h = relu( Linear(relu(Linear(h))) + h )
    num_blocks = rw1_ref.shape[0]
    for i in range(num_blocks):               # static unroll (small, fixed)
        residual = h
        t = jnp.dot(h, rw1_ref[i], preferred_element_type=jnp.float32) + rb1_ref[i]
        t = jnp.maximum(t, 0.0)
        t = jnp.dot(t, rw2_ref[i], preferred_element_type=jnp.float32) + rb2_ref[i]
        h = jnp.maximum(t + residual, 0.0)

    # ---- fused tail: one lane-dense matmul covering fc5 (cols 0:output_size)
    #      and fc6 (col output_size); padding columns are zero.
    bt = pt_ref[0:1, :]
    gt = pt_ref[1:2, :]
    bet = pt_ref[2:3, :]
    yz = jnp.dot(h, wt_ref[...], preferred_element_type=jnp.float32) + bt

    # BatchNorm (train) applied only to the real fc5 columns; identity elsewhere.
    s2 = jnp.sum(yz, axis=0, keepdims=True)
    ss2 = jnp.sum(yz * yz, axis=0, keepdims=True)
    mu2 = s2 * inv_b
    var2 = ss2 * inv_b - mu2 * mu2
    scale2 = gt * jax.lax.rsqrt(var2 + EPS)
    shift2 = bet - mu2 * scale2
    col = jax.lax.broadcasted_iota(jnp.int32, (1, yz.shape[1]), 1)
    is_bn = col < output_size
    scale2 = jnp.where(is_bn, scale2, 1.0)
    shift2 = jnp.where(is_bn, shift2, 0.0)

    out_ref[...] = (yz * scale2 + shift2).astype(out_ref.dtype)


def init_params(key, input_size=7, hidden_size=32, output_size=16, num_res_blocks=3):
    """Deterministic parameters matching the nn.Module shapes.

    Linear weights are stored transposed: (in_features, out_features).
    Biases / BN params are stored as (1, features) rows.
    """
    keys = jax.random.split(key, 16)

    def lin(k, fan_in, fan_out):
        bound = 1.0 / jnp.sqrt(fan_in)
        kw, kb = jax.random.split(k)
        w = jax.random.uniform(kw, (fan_in, fan_out), jnp.float32, -bound, bound)
        b = jax.random.uniform(kb, (1, fan_out), jnp.float32, -bound, bound)
        return w, b

    w1, b1 = lin(keys[0], input_size, hidden_size)
    g1 = jnp.ones((1, hidden_size), jnp.float32)
    be1 = jnp.zeros((1, hidden_size), jnp.float32)

    rw1, rb1, rw2, rb2 = [], [], [], []
    for i in range(num_res_blocks):
        wA, bA = lin(keys[1 + 2 * i], hidden_size, hidden_size)
        wB, bB = lin(keys[2 + 2 * i], hidden_size, hidden_size)
        rw1.append(wA); rb1.append(bA); rw2.append(wB); rb2.append(bB)
    rw1 = jnp.stack(rw1); rb1 = jnp.stack(rb1)
    rw2 = jnp.stack(rw2); rb2 = jnp.stack(rb2)

    w5, b5 = lin(keys[10], hidden_size, output_size)
    g5 = jnp.ones((1, output_size), jnp.float32)
    be5 = jnp.zeros((1, output_size), jnp.float32)

    w6, b6 = lin(keys[11], hidden_size, 1)

    return dict(
        w1=w1, b1=b1, g1=g1, be1=be1,
        rw1=rw1, rb1=rb1, rw2=rw2, rb2=rb2,
        w5=w5, b5=b5, g5=g5, be5=be5,
        w6=w6, b6=b6,
    )


def prepare_params(p, out_pad=OUT_PAD):
    """One-time layout prep: pad K of fc1 to a sublane multiple, fuse fc5||fc6
    into a single lane-dense (hidden, out_pad) tail, and pack per-layer scalar
    rows (bias / gamma / beta) into single small 2-D tiles."""
    input_size, hidden = p["w1"].shape
    output_size = p["w5"].shape[1]
    k_pad = -input_size % 8

    w1p = jnp.pad(p["w1"], ((0, k_pad), (0, 0)))            # (8, hidden), zero rows
    p1 = jnp.concatenate([p["b1"], p["g1"], p["be1"]], axis=0)  # (3, hidden)

    w_tail = jnp.zeros((hidden, out_pad), jnp.float32)
    w_tail = w_tail.at[:, :output_size].set(p["w5"])
    w_tail = w_tail.at[:, output_size].set(p["w6"][:, 0])

    b_tail = jnp.zeros((1, out_pad), jnp.float32)
    b_tail = b_tail.at[:, :output_size].set(p["b5"][0])
    b_tail = b_tail.at[:, output_size].set(p["b6"][0, 0])
    g_tail = jnp.ones((1, out_pad), jnp.float32)
    g_tail = g_tail.at[:, :output_size].set(p["g5"][0])
    be_tail = jnp.zeros((1, out_pad), jnp.float32)
    be_tail = be_tail.at[:, :output_size].set(p["be5"][0])
    p_tail = jnp.concatenate([b_tail, g_tail, be_tail], axis=0)  # (3, out_pad)

    return dict(
        w1=w1p, p1=p1,
        rw1=p["rw1"], rb1=p["rb1"], rw2=p["rw2"], rb2=p["rb2"],
        wt=w_tail, pt=p_tail,
        input_size=input_size, output_size=output_size,
    )


def fnet_forward(x, prep):
    B = x.shape[0]
    input_size = prep["input_size"]
    output_size = prep["output_size"]
    k_pad = prep["w1"].shape[0] - input_size
    x_p = jnp.pad(x, ((0, 0), (0, k_pad)))                  # (B, 8) tile-aligned

    vmem = pl.BlockSpec(memory_space=pltpu.MemorySpace.VMEM)
    n_in = 9

    slab = pl.pallas_call(
        functools.partial(fnet_kernel, output_size=output_size),
        out_shape=jax.ShapeDtypeStruct((B, OUT_PAD), jnp.float32),
        in_specs=[vmem] * n_in,
        out_specs=vmem,
    )(
        x_p,
        prep["w1"], prep["p1"],
        prep["rw1"], prep["rb1"], prep["rw2"], prep["rb2"],
        prep["wt"], prep["pt"],
    )
    concat_out = slab[:, :output_size]
    loss_out = slab[:, output_size:output_size + 1]
    return concat_out, loss_out


def _batchnorm_train_ref(h, gamma, beta):
    mu = jnp.mean(h, axis=0, keepdims=True)
    var = jnp.mean((h - mu) ** 2, axis=0, keepdims=True)
    return (h - mu) * jax.lax.rsqrt(var + EPS) * gamma + beta


def fnet_reference(x, p):
    """Pure-JAX reference mirroring the PyTorch forward (training-mode BN)."""
    h = x @ p["w1"] + p["b1"]
    h = _batchnorm_train_ref(h, p["g1"], p["be1"])
    h = jnp.maximum(h, 0.0)
    for i in range(p["rw1"].shape[0]):
        res = h
        t = jnp.maximum(h @ p["rw1"][i] + p["rb1"][i], 0.0)
        t = t @ p["rw2"][i] + p["rb2"][i]
        h = jnp.maximum(t + res, 0.0)
    y = h @ p["w5"] + p["b5"]
    y = _batchnorm_train_ref(y, p["g5"], p["be5"])
    z = h @ p["w6"] + p["b6"]
    return y, z


if __name__ == "__main__":
    key = jax.random.PRNGKey(0)
    k_x, k_p = jax.random.split(key)

    B, input_size, hidden_size, output_size = 8, 7, 32, 16
    x = jax.random.normal(k_x, (B, input_size), jnp.float32)
    params = init_params(k_p, input_size, hidden_size, output_size, num_res_blocks=3)
    prep = prepare_params(params)

    concat_out, loss_out = fnet_forward(x, prep)
    jax.block_until_ready((concat_out, loss_out))

    ref_concat, ref_loss = fnet_reference(x, params)
    assert concat_out.shape == (B, output_size) and loss_out.shape == (B, 1)
    assert jnp.allclose(concat_out, ref_concat, atol=1e-4, rtol=1e-4)
    assert jnp.allclose(loss_out, ref_loss, atol=1e-4, rtol=1e-4)

    print("KERNEL_OK")
</pallas_src>

<mosaic_0001>
module attributes {stable_mosaic.version = 11 : i64} {
  func.func @fnet_kernel(%arg0: memref<8x8xf32, #tpu.memory_space<vmem>>, %arg1: memref<8x32xf32, #tpu.memory_space<vmem>>, %arg2: memref<3x32xf32, #tpu.memory_space<vmem>>, %arg3: memref<3x32x32xf32, #tpu.memory_space<vmem>>, %arg4: memref<3x1x32xf32, #tpu.memory_space<vmem>>, %arg5: memref<3x32x32xf32, #tpu.memory_space<vmem>>, %arg6: memref<3x1x32xf32, #tpu.memory_space<vmem>>, %arg7: memref<32x128xf32, #tpu.memory_space<vmem>>, %arg8: memref<3x128xf32, #tpu.memory_space<vmem>>, %arg9: memref<8x128xf32, #tpu.memory_space<vmem>>) attributes {dimension_semantics = [], scalar_prefetch = 0 : i64, scratch_operands = 0 : i64, tpu.core_type = #tpu.core_type<tc>} {
    %c0 = arith.constant 0 : index
    %c0_0 = arith.constant 0 : index
    %0 = vector.load %arg0[%c0, %c0_0] : memref<8x8xf32, #tpu.memory_space<vmem>>, vector<8x8xf32>
    %c0_1 = arith.constant 0 : index
    %c0_2 = arith.constant 0 : index
    %1 = vector.load %arg2[%c0_1, %c0_2] : memref<3x32xf32, #tpu.memory_space<vmem>>, vector<1x32xf32>
    %c1 = arith.constant 1 : index
    %c0_3 = arith.constant 0 : index
    %2 = vector.load %arg2[%c1, %c0_3] : memref<3x32xf32, #tpu.memory_space<vmem>>, vector<1x32xf32>
    %c2 = arith.constant 2 : index
    %c0_4 = arith.constant 0 : index
    %3 = vector.load %arg2[%c2, %c0_4] : memref<3x32xf32, #tpu.memory_space<vmem>>, vector<1x32xf32>
    %c0_5 = arith.constant 0 : index
    %c0_6 = arith.constant 0 : index
    %4 = vector.load %arg1[%c0_5, %c0_6] : memref<8x32xf32, #tpu.memory_space<vmem>>, vector<8x32xf32>
    %cst = arith.constant dense<0.000000e+00> : vector<8x32xf32>
    %5 = tpu.matmul %0, %4, %cst {dimension_numbers = #tpu.dot_dimension_numbers<[1], [0], [0], [1], [0, 0, 1, 1], [], []>} : vector<8x8xf32>, vector<8x32xf32>, vector<8x32xf32> -> vector<8x32xf32>
    %6 = vector.broadcast %1 : vector<1x32xf32> to vector<8x32xf32>
    %7 = arith.addf %5, %6 : vector<8x32xf32>
    %cst_7 = arith.constant dense<0.000000e+00> : vector<32xf32>
    %8 = vector.multi_reduction <add>, %7, %cst_7 [0] : vector<8x32xf32> to vector<32xf32>
    %9 = vector.shape_cast %8 : vector<32xf32> to vector<1x32xf32>
    %10 = arith.mulf %7, %7 : vector<8x32xf32>
    %cst_8 = arith.constant dense<0.000000e+00> : vector<32xf32>
    %11 = vector.multi_reduction <add>, %10, %cst_8 [0] : vector<8x32xf32> to vector<32xf32>
    %12 = vector.shape_cast %11 : vector<32xf32> to vector<1x32xf32>
    %cst_9 = arith.constant 1.250000e-01 : f32
    %13 = vector.broadcast %cst_9 : f32 to vector<1x32xf32>
    %14 = arith.mulf %9, %13 : vector<1x32xf32>
    %cst_10 = arith.constant 1.250000e-01 : f32
    %15 = vector.broadcast %cst_10 : f32 to vector<1x32xf32>
    %16 = arith.mulf %12, %15 : vector<1x32xf32>
    %17 = arith.mulf %14, %14 : vector<1x32xf32>
    %18 = arith.subf %16, %17 : vector<1x32xf32>
    %cst_11 = arith.constant 9.99999974E-6 : f32
    %19 = vector.broadcast %cst_11 : f32 to vector<1x32xf32>
    %20 = arith.addf %18, %19 : vector<1x32xf32>
    %21 = math.rsqrt %20 : vector<1x32xf32>
    %22 = arith.mulf %2, %21 : vector<1x32xf32>
    %23 = arith.mulf %14, %22 : vector<1x32xf32>
    %24 = arith.subf %3, %23 : vector<1x32xf32>
    %25 = vector.broadcast %22 : vector<1x32xf32> to vector<8x32xf32>
    %26 = arith.mulf %7, %25 : vector<8x32xf32>
    %27 = vector.broadcast %24 : vector<1x32xf32> to vector<8x32xf32>
    %28 = arith.addf %26, %27 : vector<8x32xf32>
    %cst_12 = arith.constant 0.000000e+00 : f32
    %29 = vector.broadcast %cst_12 : f32 to vector<8x32xf32>
    %30 = arith.maximumf %28, %29 : vector<8x32xf32>
    %c0_13 = arith.constant 0 : index
    %c0_14 = arith.constant 0 : index
    %c0_15 = arith.constant 0 : index
    %31 = vector.load %arg3[%c0_13, %c0_14, %c0_15] : memref<3x32x32xf32, #tpu.memory_space<vmem>>, vector<1x32x32xf32>
    %32 = vector.shape_cast %31 : vector<1x32x32xf32> to vector<32x32xf32>
    %cst_16 = arith.constant dense<0.000000e+00> : vector<8x32xf32>
    %33 = tpu.matmul %30, %32, %cst_16 {dimension_numbers = #tpu.dot_dimension_numbers<[1], [0], [0], [1], [0, 0, 1, 1], [], []>} : vector<8x32xf32>, vector<32x32xf32>, vector<8x32xf32> -> vector<8x32xf32>
    %c0_17 = arith.constant 0 : index
    %c0_18 = arith.constant 0 : index
    %c0_19 = arith.constant 0 : index
    %34 = vector.load %arg4[%c0_17, %c0_18, %c0_19] : memref<3x1x32xf32, #tpu.memory_space<vmem>>, vector<1x1x32xf32>
    %35 = vector.shape_cast %34 : vector<1x1x32xf32> to vector<1x32xf32>
    %36 = vector.broadcast %35 : vector<1x32xf32> to vector<8x32xf32>
    %37 = arith.addf %33, %36 : vector<8x32xf32>
    %cst_20 = arith.constant 0.000000e+00 : f32
    %38 = vector.broadcast %cst_20 : f32 to vector<8x32xf32>
    %39 = arith.maximumf %37, %38 : vector<8x32xf32>
    %c0_21 = arith.constant 0 : index
    %c0_22 = arith.constant 0 : index
    %c0_23 = arith.constant 0 : index
    %40 = vector.load %arg5[%c0_21, %c0_22, %c0_23] : memref<3x32x32xf32, #tpu.memory_space<vmem>>, vector<1x32x32xf32>
    %41 = vector.shape_cast %40 : vector<1x32x32xf32> to vector<32x32xf32>
    %cst_24 = arith.constant dense<0.000000e+00> : vector<8x32xf32>
    %42 = tpu.matmul %39, %41, %cst_24 {dimension_numbers = #tpu.dot_dimension_numbers<[1], [0], [0], [1], [0, 0, 1, 1], [], []>} : vector<8x32xf32>, vector<32x32xf32>, vector<8x32xf32> -> vector<8x32xf32>
    %c0_25 = arith.constant 0 : index
    %c0_26 = arith.constant 0 : index
    %c0_27 = arith.constant 0 : index
    %43 = vector.load %arg6[%c0_25, %c0_26, %c0_27] : memref<3x1x32xf32, #tpu.memory_space<vmem>>, vector<1x1x32xf32>
    %44 = vector.shape_cast %43 : vector<1x1x32xf32> to vector<1x32xf32>
    %45 = vector.broadcast %44 : vector<1x32xf32> to vector<8x32xf32>
    %46 = arith.addf %42, %45 : vector<8x32xf32>
    %47 = arith.addf %46, %30 : vector<8x32xf32>
    %cst_28 = arith.constant 0.000000e+00 : f32
    %48 = vector.broadcast %cst_28 : f32 to vector<8x32xf32>
    %49 = arith.maximumf %47, %48 : vector<8x32xf32>
    %c1_29 = arith.constant 1 : index
    %c0_30 = arith.constant 0 : index
    %c0_31 = arith.constant 0 : index
    %50 = vector.load %arg3[%c1_29, %c0_30, %c0_31] : memref<3x32x32xf32, #tpu.memory_space<vmem>>, vector<1x32x32xf32>
    %51 = vector.shape_cast %50 : vector<1x32x32xf32> to vector<32x32xf32>
    %cst_32 = arith.constant dense<0.000000e+00> : vector<8x32xf32>
    %52 = tpu.matmul %49, %51, %cst_32 {dimension_numbers = #tpu.dot_dimension_numbers<[1], [0], [0], [1], [0, 0, 1, 1], [], []>} : vector<8x32xf32>, vector<32x32xf32>, vector<8x32xf32> -> vector<8x32xf32>
    %c1_33 = arith.constant 1 : index
    %c0_34 = arith.constant 0 : index
    %c0_35 = arith.constant 0 : index
    %53 = vector.load %arg4[%c1_33, %c0_34, %c0_35] : memref<3x1x32xf32, #tpu.memory_space<vmem>>, vector<1x1x32xf32>
    %54 = vector.shape_cast %53 : vector<1x1x32xf32> to vector<1x32xf32>
    %55 = vector.broadcast %54 : vector<1x32xf32> to vector<8x32xf32>
    %56 = arith.addf %52, %55 : vector<8x32xf32>
    %cst_36 = arith.constant 0.000000e+00 : f32
    %57 = vector.broadcast %cst_36 : f32 to vector<8x32xf32>
    %58 = arith.maximumf %56, %57 : vector<8x32xf32>
    %c1_37 = arith.constant 1 : index
    %c0_38 = arith.constant 0 : index
    %c0_39 = arith.constant 0 : index
    %59 = vector.load %arg5[%c1_37, %c0_38, %c0_39] : memref<3x32x32xf32, #tpu.memory_space<vmem>>, vector<1x32x32xf32>
    %60 = vector.shape_cast %59 : vector<1x32x32xf32> to vector<32x32xf32>
    %cst_40 = arith.constant dense<0.000000e+00> : vector<8x32xf32>
    %61 = tpu.matmul %58, %60, %cst_40 {dimension_numbers = #tpu.dot_dimension_numbers<[1], [0], [0], [1], [0, 0, 1, 1], [], []>} : vector<8x32xf32>, vector<32x32xf32>, vector<8x32xf32> -> vector<8x32xf32>
    %c1_41 = arith.constant 1 : index
    %c0_42 = arith.constant 0 : index
    %c0_43 = arith.constant 0 : index
    %62 = vector.load %arg6[%c1_41, %c0_42, %c0_43] : memref<3x1x32xf32, #tpu.memory_space<vmem>>, vector<1x1x32xf32>
    %63 = vector.shape_cast %62 : vector<1x1x32xf32> to vector<1x32xf32>
    %64 = vector.broadcast %63 : vector<1x32xf32> to vector<8x32xf32>
    %65 = arith.addf %61, %64 : vector<8x32xf32>
    %66 = arith.addf %65, %49 : vector<8x32xf32>
    %cst_44 = arith.constant 0.000000e+00 : f32
    %67 = vector.broadcast %cst_44 : f32 to vector<8x32xf32>
    %68 = arith.maximumf %66, %67 : vector<8x32xf32>
    %c2_45 = arith.constant 2 : index
    %c0_46 = arith.constant 0 : index
    %c0_47 = arith.constant 0 : index
    %69 = vector.load %arg3[%c2_45, %c0_46, %c0_47] : memref<3x32x32xf32, #tpu.memory_space<vmem>>, vector<1x32x32xf32>
    %70 = vector.shape_cast %69 : vector<1x32x32xf32> to vector<32x32xf32>
    %cst_48 = arith.constant dense<0.000000e+00> : vector<8x32xf32>
    %71 = tpu.matmul %68, %70, %cst_48 {dimension_numbers = #tpu.dot_dimension_numbers<[1], [0], [0], [1], [0, 0, 1, 1], [], []>} : vector<8x32xf32>, vector<32x32xf32>, vector<8x32xf32> -> vector<8x32xf32>
    %c2_49 = arith.constant 2 : index
    %c0_50 = arith.constant 0 : index
    %c0_51 = arith.constant 0 : index
    %72 = vector.load %arg4[%c2_49, %c0_50, %c0_51] : memref<3x1x32xf32, #tpu.memory_space<vmem>>, vector<1x1x32xf32>
    %73 = vector.shape_cast %72 : vector<1x1x32xf32> to vector<1x32xf32>
    %74 = vector.broadcast %73 : vector<1x32xf32> to vector<8x32xf32>
    %75 = arith.addf %71, %74 : vector<8x32xf32>
    %cst_52 = arith.constant 0.000000e+00 : f32
    %76 = vector.broadcast %cst_52 : f32 to vector<8x32xf32>
    %77 = arith.maximumf %75, %76 : vector<8x32xf32>
    %c2_53 = arith.constant 2 : index
    %c0_54 = arith.constant 0 : index
    %c0_55 = arith.constant 0 : index
    %78 = vector.load %arg5[%c2_53, %c0_54, %c0_55] : memref<3x32x32xf32, #tpu.memory_space<vmem>>, vector<1x32x32xf32>
    %79 = vector.shape_cast %78 : vector<1x32x32xf32> to vector<32x32xf32>
    %cst_56 = arith.constant dense<0.000000e+00> : vector<8x32xf32>
    %80 = tpu.matmul %77, %79, %cst_56 {dimension_numbers = #tpu.dot_dimension_numbers<[1], [0], [0], [1], [0, 0, 1, 1], [], []>} : vector<8x32xf32>, vector<32x32xf32>, vector<8x32xf32> -> vector<8x32xf32>
    %c2_57 = arith.constant 2 : index
    %c0_58 = arith.constant 0 : index
    %c0_59 = arith.constant 0 : index
    %81 = vector.load %arg6[%c2_57, %c0_58, %c0_59] : memref<3x1x32xf32, #tpu.memory_space<vmem>>, vector<1x1x32xf32>
    %82 = vector.shape_cast %81 : vector<1x1x32xf32> to vector<1x32xf32>
    %83 = vector.broadcast %82 : vector<1x32xf32> to vector<8x32xf32>
    %84 = arith.addf %80, %83 : vector<8x32xf32>
    %85 = arith.addf %84, %68 : vector<8x32xf32>
    %cst_60 = arith.constant 0.000000e+00 : f32
    %86 = vector.broadcast %cst_60 : f32 to vector<8x32xf32>
    %87 = arith.maximumf %85, %86 : vector<8x32xf32>
    %c0_61 = arith.constant 0 : index
    %c0_62 = arith.constant 0 : index
    %88 = vector.load %arg8[%c0_61, %c0_62] : memref<3x128xf32, #tpu.memory_space<vmem>>, vector<1x128xf32>
    %c1_63 = arith.constant 1 : index
    %c0_64 = arith.constant 0 : index
    %89 = vector.load %arg8[%c1_63, %c0_64] : memref<3x128xf32, #tpu.memory_space<vmem>>, vector<1x128xf32>
    %c2_65 = arith.constant 2 : index
    %c0_66 = arith.constant 0 : index
    %90 = vector.load %arg8[%c2_65, %c0_66] : memref<3x128xf32, #tpu.memory_space<vmem>>, vector<1x128xf32>
    %c0_67 = arith.constant 0 : index
    %c0_68 = arith.constant 0 : index
    %91 = vector.load %arg7[%c0_67, %c0_68] : memref<32x128xf32, #tpu.memory_space<vmem>>, vector<32x128xf32>
    %cst_69 = arith.constant dense<0.000000e+00> : vector<8x128xf32>
    %92 = tpu.matmul %87, %91, %cst_69 {dimension_numbers = #tpu.dot_dimension_numbers<[1], [0], [0], [1], [0, 0, 1, 1], [], []>} : vector<8x32xf32>, vector<32x128xf32>, vector<8x128xf32> -> vector<8x128xf32>
    %93 = vector.broadcast %88 : vector<1x128xf32> to vector<8x128xf32>
    %94 = arith.addf %92, %93 : vector<8x128xf32>
    %cst_70 = arith.constant dense<0.000000e+00> : vector<128xf32>
    %95 = vector.multi_reduction <add>, %94, %cst_70 [0] : vector<8x128xf32> to vector<128xf32>
    %96 = vector.shape_cast %95 : vector<128xf32> to vector<1x128xf32>
    %97 = arith.mulf %94, %94 : vector<8x128xf32>
    %cst_71 = arith.constant dense<0.000000e+00> : vector<128xf32>
    %98 = vector.multi_reduction <add>, %97, %cst_71 [0] : vector<8x128xf32> to vector<128xf32>
    %99 = vector.shape_cast %98 : vector<128xf32> to vector<1x128xf32>
    %cst_72 = arith.constant 1.250000e-01 : f32
    %100 = vector.broadcast %cst_72 : f32 to vector<1x128xf32>
    %101 = arith.mulf %96, %100 : vector<1x128xf32>
    %cst_73 = arith.constant 1.250000e-01 : f32
    %102 = vector.broadcast %cst_73 : f32 to vector<1x128xf32>
    %103 = arith.mulf %99, %102 : vector<1x128xf32>
    %104 = arith.mulf %101, %101 : vector<1x128xf32>
    %105 = arith.subf %103, %104 : vector<1x128xf32>
    %cst_74 = arith.constant 9.99999974E-6 : f32
    %106 = vector.broadcast %cst_74 : f32 to vector<1x128xf32>
    %107 = arith.addf %105, %106 : vector<1x128xf32>
    %108 = math.rsqrt %107 : vector<1x128xf32>
    %109 = arith.mulf %89, %108 : vector<1x128xf32>
    %110 = arith.mulf %101, %109 : vector<1x128xf32>
    %111 = arith.subf %90, %110 : vector<1x128xf32>
    %112 = tpu.iota {dimensions = array<i32: 1>} : vector<1x128xi32>
    %c16_i32 = arith.constant 16 : i32
    %113 = vector.broadcast %c16_i32 : i32 to vector<1x128xi32>
    %114 = arith.cmpi slt, %112, %113 : vector<1x128xi32>
    %cst_75 = arith.constant 1.000000e+00 : f32
    %115 = vector.broadcast %cst_75 : f32 to vector<1x128xf32>
    %116 = arith.select %114, %109, %115 : vector<1x128xi1>, vector<1x128xf32>
    %cst_76 = arith.constant 0.000000e+00 : f32
    %117 = vector.broadcast %cst_76 : f32 to vector<1x128xf32>
    %118 = arith.select %114, %111, %117 : vector<1x128xi1>, vector<1x128xf32>
    %119 = vector.broadcast %116 : vector<1x128xf32> to vector<8x128xf32>
    %120 = arith.mulf %94, %119 : vector<8x128xf32>
    %121 = vector.broadcast %118 : vector<1x128xf32> to vector<8x128xf32>
    %122 = arith.addf %120, %121 : vector<8x128xf32>
    %c0_77 = arith.constant 0 : index
    %c0_78 = arith.constant 0 : index
    %123 = vector.load %arg9[%c0_77, %c0_78] : memref<8x128xf32, #tpu.memory_space<vmem>>, vector<8x128xf32>
    tpu.vector_store %arg9[%c0_77, %c0_78], %122 {strides = array<i32>} : memref<8x128xf32, #tpu.memory_space<vmem>>, vector<8x128xf32>,
    return
  }
}

</mosaic_0001>

<bundles_post_ra>
// kernel: tpu_custom_call.1
= control target key start
LH: loop header
LB: loop body
LE: loop exit
PB: predicated region body
PF: predicated region fallthrough
CT: control target
= control target key end

     0   :  { %14 = vsyncpa [#allocation3], 0  ;;  %s858_s0 = inlined_call_operand.hbm [shape: f32[8,8], index: 0, kind: input, shape index: {}]   ;;  %s859_s1 = inlined_call_operand.hbm [shape: f32[8,32], index: 1, kind: input, shape index: {}]   ;;  %s860_s2 = inlined_call_operand.hbm [shape: f32[3,32], index: 2, kind: input, shape index: {}]   ;;  %s861_s3 = inlined_call_operand.hbm [shape: f32[3,32,32], index: 3, kind: input, shape index: {}]   ;;  %s862_s4 = inlined_call_operand.vmem [shape: f32[3,1,32], index: 4, kind: input, shape index: {}]   ;;  %s863_s5 = inlined_call_operand.hbm [shape: f32[3,32,32], index: 5, kind: input, shape index: {}]   ;;  %s864_s6 = inlined_call_operand.hbm [shape: f32[3,1,32], index: 6, kind: input, shape index: {}]   ;;  %s865_s7 = inlined_call_operand.hbm [shape: f32[32,128], index: 7, kind: input, shape index: {}]   ;;  %s866_s8 = inlined_call_operand.vmem [shape: f32[3,128], index: 8, kind: input, shape index: {}]   ;;  %s867_s9 = inlined_call_operand.hbm [shape: f32[8,128], index: 9, kind: output, shape index: {}]  }
   0x1   :  { %15 = vsyncpa [#allocation6], 0 }
   0x2   :  { %16 = vsyncpa [#allocation9], 0 }
   0x3   :  { %17 = vsyncpa [#allocation12], 0  ;;  %s35_s11 = sshll.u32 %s859_s1, 4  ;;  %s36_s11 = int_to_ptr.hbm [resolvable:$true] %s35_s11 }
   0x4   :  { %18 = vsyncpa [#allocation4], 0  ;;  %s736_s12 = smov [#allocation5]   ;;  %s56_s16 = sshll.u32 %s861_s3, 4  ;;  %s57_s16 = int_to_ptr.hbm [resolvable:$true] %s56_s16 }
   0x5   :  { %s37_s13 = sshll.u32 %s736_s12, 4  ;;  %s737_s17 = smov [#allocation8]   ;;  %s38_s13 = int_to_ptr.vmem [resolvable:$true] %s37_s13 }
   0x6   :  { %40 = dma.hbm_to_vmem [thread:$0]  %s36_s11, 128, %s38_s13, [#allocation6]  }
   0x7   :  { %s58_s18 = sshll.u32 %s737_s17, 4  ;;  %s738_s19 = smov 128   ;;  %s59_s18 = int_to_ptr.vmem [resolvable:$true] %s58_s18 }
   0x8   :  { %s739_s20 = smov 8   ;;  %s84_s22 = sshll.u32 %s864_s6, 4  ;;  %s85_s22 = int_to_ptr.hbm [resolvable:$true] %s84_s22 }
   0x9   :  { %64 = dma.hbm_to_vmem [thread:$0]  %s57_s16, 1536, %s59_s18, [#allocation9], %s738_s19, %s738_s19, %s739_s20  }
   0xa   :  { %s740_s23 = smov [#allocation11]   ;;  %s24_s26 = sshll.u32 %s858_s0, 4  ;;  %s25_s26 = int_to_ptr.hbm [resolvable:$true] %s24_s26 }
   0xb   :  { %s86_s24 = sshll.u32 %s740_s23, 4  ;;  %s741_s27 = smov 16   ;;  %s87_s24 = int_to_ptr.vmem [resolvable:$true] %s86_s24 }
   0xc   :  { %s742_s28 = smov 1   ;;  %s743_s29 = smov [#allocation2]  }
   0xd   :  { %92 = dma.hbm_to_vmem [thread:$0]  %s85_s22, 48, %s87_s24, [#allocation12], %s741_s27, %s741_s27, %s742_s28  }
   0xe   :  { %s26_s30 = sshll.u32 %s743_s29, 4  ;;  %s46_s12 = sshll.u32 %s860_s2, 4  ;;  %s27_s30 = int_to_ptr.vmem [resolvable:$true] %s26_s30  ;;  %s47_s12 = int_to_ptr.hbm [resolvable:$true] %s46_s12 }
   0xf   :  { %29 = dma.hbm_to_vmem [thread:$0]  %s25_s26, 128, %s27_s30, [#allocation3]  }
  0x10   :  { %s71_s14 = sshll.u32 %s863_s5, 4  ;;  %s744_s15 = smov [#allocation7]   ;;  %s72_s14 = int_to_ptr.hbm [resolvable:$true] %s71_s14 }
  0x11   :  { %s48_s16 = sshll.u32 %s744_s15, 4  ;;  %s745_s0 = smov [#allocation10]   ;;  %s49_s16 = int_to_ptr.vmem [resolvable:$true] %s48_s16 }
  0x12   :  { %51 = dma.hbm_to_vmem [thread:$0]  %s47_s12, 64, %s49_s16, [#allocation6]  }
  0x13   :  { %s73_s17 = sshll.u32 %s745_s0, 4  ;;  %s97_s21 = sshll.u32 %s865_s7, 4  ;;  %s74_s17 = int_to_ptr.vmem [resolvable:$true] %s73_s17  ;;  %s98_s21 = int_to_ptr.hbm [resolvable:$true] %s97_s21 }
  0x14   :  { %79 = dma.hbm_to_vmem [thread:$0]  %s72_s14, 1536, %s74_s17, [#allocation9], %s738_s19, %s738_s19, %s739_s20  }
  0x15   :  { %s746_s2 = smov [#allocation13]  }
  0x16   :  { %s99_s22 = sshll.u32 %s746_s2, 4  ;;  %s100_s22 = int_to_ptr.vmem [resolvable:$true] %s99_s22 }
  0x17   :  { %105 = dma.hbm_to_vmem [thread:$0]  %s98_s21, 512, %s100_s22, [#allocation12], %s738_s19, %s738_s19, %s739_s20  }
  0x18   :  { %726 = dma.done.wait [#allocation3], 128  }
  0x19   :  { %727 = vsyncadd [#allocation3], 4294967168 }
  0x1a   :  { %728 = dma.done.wait [#allocation6], 192  }
  0x1b   :  { %729 = vsyncadd [#allocation6], 4294967104 }
  0x1c   :  { %730 = dma.done.wait [#allocation9], 3072  }
  0x1d   :  { %731 = vsyncadd [#allocation9], 4294964224 }
  0x1e   :  { %732 = dma.done.wait [#allocation12], 560  }
  0x1f   :  { %733 = vsyncadd [#allocation12], 4294966736  ;;  %vm142_vm0 = vcmask 64512   ;;  %v140_v0 = vld [vmem:[#allocation5] sm:$0xff]  ;;  %v136_v1 = vld [vmem:[#allocation2] sm:$0xff]  ;;  %vm166_vm1 = vcmask 261120  }
  0x20   :  { %161 = vmatpush.msra.mxu0 %v140_v0  ;;  %v522_v2 = vld [vmem:[#allocation7] ss:$0 sm:$0xff]  ;;  %v207_v20 = vld [vmem:[#allocation8 + $0x10] sm:$0xff]  ;;  %v206_v23 = vld [vmem:[#allocation8 + $0x8] sm:$0xff]  ;;  %s747_s29 = smov [#allocation14]   ;;  %s487_s12 = sshll.u32 %s867_s9, 4  ;;  %s488_s12 = int_to_ptr.hbm [resolvable:$true] %s487_s12 }
  0x21   :  { %500 = vmatmul.msk.f32.vlgmr.msra.gmra.mxu0 %vm142_vm0, %v136_v1  ;;  %v208_v19 = vld [vmem:[#allocation8 + $0x18] sm:$0xff]  ;;  %v205_v26 = vld [vmem:[#allocation8] sm:$0xff]  ;;  %v239_v47 = vld [vmem:[#allocation10 + $0x10] sm:$0xff]  ;;  %s485_s30 = sshll.u32 %s747_s29, 4  ;;  %s486_s30 = int_to_ptr.vmem [resolvable:$true] %s485_s30 }
  0x22   :  { %228 = vmatpush.msra.mxu1 %v208_v19  ;;  %v240_v29 = vld [vmem:[#allocation10 + $0x18] sm:$0xff]  ;;  %v238_v48 = vld [vmem:[#allocation10 + $0x8] sm:$0xff]  ;;  %v237_v49 = vld [vmem:[#allocation10] sm:$0xff] }
  0x23   :  { %260 = vmatpush.msra.mxu2 %v240_v29  ;;  %v138_v35 = vld [vmem:[#allocation7 + $0x1] sm:$0x1]  ;;  %v139_v39 = vld [vmem:[#allocation7 + $0x2] sm:$0x1]  ;;  %v523_v50 = vld [vmem:[%s862_s4] ss:$0 sm:$0xff] }
  0x24   :  { %229 = vmatpush.msra.mxu1 %v207_v20  ;;  %v274_v54 = vld [vmem:[#allocation8 + $0x38] sm:$0xff]  ;;  %v273_v55 = vld [vmem:[#allocation8 + $0x30] sm:$0xff]  ;;  %v272_v56 = vld [vmem:[#allocation8 + $0x28] sm:$0xff] }
  0x25   :  { %261 = vmatpush.msra.mxu2 %v239_v47  ;;  %295 = vmatpush.msra.mxu3 %v274_v54  ;;  %v271_v57 = vld [vmem:[#allocation8 + $0x20] sm:$0xff]  ;;  %v308_v58 = vld [vmem:[#allocation10 + $0x38] sm:$0xff]  ;;  %v307_v59 = vld [vmem:[#allocation10 + $0x30] sm:$0xff] }
  0x26   :  { %230 = vmatpush.msra.mxu1 %v206_v23  ;;  %329 = vmatpush.msrb.mxu0 %v308_v58  ;;  %v524_v60 = vld [vmem:[#allocation11] ss:$0 sm:$0xff]  ;;  %v306_v1 = vld [vmem:[#allocation10 + $0x28] sm:$0xff] }
  0x27   :  { %262 = vmatpush.msra.mxu2 %v238_v48  ;;  %296 = vmatpush.msra.mxu3 %v273_v55  ;;  %v374_v19 = vld [vmem:[#allocation10 + $0x40] sm:$0xff] }
  0x28   :  { %231 = vmatpush.msra.mxu1 %v205_v26  ;;  %330 = vmatpush.msrb.mxu0 %v307_v59  ;;  %v414_v20 = vld [vmem:[#allocation13 + $0x18] sm:$0xff]  ;;  %v412_v26 = vld [vmem:[#allocation13 + $0x8] sm:$0xff] }
  0x29   :  { %263 = vmatpush.msra.mxu2 %v237_v49  ;;  %297 = vmatpush.msra.mxu3 %v272_v56 }
  0x2a   :  { %331 = vmatpush.msrb.mxu0 %v306_v1  ;;  %v410_v1 = vld [vmem:[%s866_s8 + $0x2] sm:$0x1] }
  0x2b   :  { %298 = vmatpush.msra.mxu3 %v271_v57  ;;  %v470_v57 = vlaneseq }
  0x2d   :  { %431 = vmatpush.msrb.mxu3 %v414_v20 }
  0x9e   :  { %v163_v3 = vpop.f32.mrf.mxu0 }
  0x9f   :  { %v164_v4 = vadd.f32 %v522_v2, %v163_v3  ;;  %v305_v2 = vld [vmem:[#allocation10 + $0x20] sm:$0xff]  ;;  %v343_v3 = vld [vmem:[#allocation8 + $0x58] sm:$0xff] }
  0xa0   :  { %332 = vmatpush.msrb.mxu0 %v305_v2  ;;  %364 = vmatpush.msrb.mxu1 %v343_v3 }
  0xa1   :  { %v167_v5 = vsel %vm166_vm1, %v164_v4, 0.0  ;;  %v174_v6 = vmul.f32 %v164_v4, %v164_v4 }
  0xa2   :  { %v168_v7 = vrot.slane %v167_v5, 4 }
  0xa3   :  { %v175_v8 = vsel %vm166_vm1, %v174_v6, 0.0 }
  0xa4   :  { %v169_v9 = vadd.f32 %v168_v7, %v167_v5  ;;  %v176_v10 = vrot.slane %v175_v8, 4 }
  0xa6   :  { %v170_v11 = vrot.slane %v169_v9, 2  ;;  %v177_v12 = vadd.f32 %v176_v10, %v175_v8  ;;  %v342_v8 = vld [vmem:[#allocation8 + $0x50] sm:$0xff]  ;;  %v340_v10 = vld [vmem:[#allocation8 + $0x40] sm:$0xff] }
  0xa7   :  { %365 = vmatpush.msrb.mxu1 %v342_v8 }
  0xa8   :  { %v171_v13 = vadd.f32 %v170_v11, %v169_v9  ;;  %v178_v14 = vrot.slane %v177_v12, 2  ;;  %v341_v9 = vld [vmem:[#allocation8 + $0x48] sm:$0xff]  ;;  %v377_v11 = vld [vmem:[#allocation10 + $0x58] sm:$0xff] }
  0xa9   :  { %366 = vmatpush.msrb.mxu1 %v341_v9  ;;  %398 = vmatpush.msrb.mxu2 %v377_v11 }
  0xaa   :  { %v172_v15 = vrot.slane %v171_v13, 1  ;;  %v179_v16 = vadd.f32 %v178_v14, %v177_v12  ;;  %v376_v12 = vld [vmem:[#allocation10 + $0x50] sm:$0xff] }
  0xab   :  { %367 = vmatpush.msrb.mxu1 %v340_v10  ;;  %399 = vmatpush.msrb.mxu2 %v376_v12 }
  0xac   :  { %v173_v17 = vadd.f32 %v172_v15, %v171_v13  ;;  %v180_v18 = vrot.slane %v179_v16, 1  ;;  %v526_v13 = vld [vmem:[#allocation11 + $0x1] ss:$0 sm:$0xff] }
  0xae   :  { %v181_v21 = vadd.f32 %v180_v18, %v179_v16  ;;  %v182_v22 = vmul.f32 0.125, %v173_v17  ;;  %v375_v18 = vld [vmem:[#allocation10 + $0x48] sm:$0xff] }
  0xaf   :  { %400 = vmatpush.msrb.mxu2 %v375_v18 }
  0xb0   :  { %v183_v24 = vmul.f32 0.125, %v181_v21  ;;  %v184_v25 = vmul.f32 %v182_v22, %v182_v22  ;;  %v527_v21 = vld [vmem:[%s862_s4 + $0x2] ss:$0 sm:$0xff] }
  0xb1   :  { %401 = vmatpush.msrb.mxu2 %v374_v19 }
  0xb2   :  { %v185_v27 = vsub.f32 %v183_v24, %v184_v25  ;;  %v413_v25 = vld [vmem:[#allocation13 + $0x10] sm:$0xff] }
  0xb3   :  { %432 = vmatpush.msrb.mxu3 %v413_v25 }
  0xb4   :  { %v186_v28 = vadd.f32 1e-05, %v185_v27  ;;  %v411_v27 = vld [vmem:[#allocation13] sm:$0xff] }
  0xb5   :  { %433 = vmatpush.msrb.mxu3 %v412_v26 }
  0xb6   :  { %530 = vrsqrt.f32 %v186_v28  ;;  %vm193_vm3 = vweird.f32 %v186_v28 }
  0xb7   :  { %434 = vmatpush.msrb.mxu3 %v411_v27 }
  0xbc   :  { %v531_v30 = vpop.eup %530 }
  0xbd   :  { %v188_v31 = vmul.f32 %v531_v30, %v186_v28  ;;  %vm194_vm2 = vweird.f32 %v531_v30  ;;  %v528_v28 = vld [vmem:[#allocation11 + $0x2] ss:$0 sm:$0xff] }
  0xbe   :  { %vm195_vm4 = vmor %vm193_vm3, %vm194_vm2 }
  0xbf   :  { %v189_v32 = vmul.f32 %v531_v30, %v188_v31 }
  0xc1   :  { %v190_v33 = vmul.f32 0.5, %v189_v32 }
  0xc3   :  { %v191_v34 = vsub.f32 1.5, %v190_v33  ;;  %v529_v33 = vld [vmem:[%s866_s8] ss:$0 sm:$0xff] }
  0xc5   :  { %v192_v36 = vmul.f32 %v531_v30, %v191_v34 }
  0xc7   :  { %v196_v37 = vsel %vm195_vm4, %v531_v30, %v192_v36 }
  0xc8   :  { %v197_v38 = vmul.f32 %v196_v37, %v138_v35 }
  0xca   :  { %v200_v40 = vperm.slane %v197_v38, 0  ;;  %v198_v41 = vmul.f32 %v197_v38, %v182_v22 }
  0xcc   :  { %v199_v42 = vsub.f32 %v139_v39, %v198_v41  ;;  %v201_v43 = vmul.f32 %v200_v40, %v164_v4  ;;  %v525_v4 = vld [vmem:[%s862_s4 + $0x1] ss:$0 sm:$0xff] }
  0xce   :  { %v202_v44 = vperm.slane %v199_v42, 0 }
  0xd0   :  { %v203_v45 = vadd.f32 %v202_v44, %v201_v43 }
  0xd2   :  { %v204_v46 = vmax.f32 %v203_v45, 0.0 }
  0xd4   :  { %501 = vmatmul.msk.f32.vlgmr.msra.gmra.mxu1 %vm166_vm1, %v204_v46 }
 0x151   :  { %v233_v51 = vpop.f32.mrf.mxu1 }
 0x152   :  { %v234_v52 = vadd.f32 %v523_v50, %v233_v51 }
 0x154   :  { %v236_v53 = vmax.f32 %v234_v52, 0.0 }
 0x156   :  { %502 = vmatmul.msk.f32.vlgmr.msra.gmra.mxu2 %vm166_vm1, %v236_v53 }
 0x1d9   :  { %v265_v61 = vpop.f32.mrf.mxu2 }
 0x1da   :  { %v266_v62 = vadd.f32 %v524_v60, %v265_v61  ;;  %v471_v60 = vand.u32 127, %v470_v57  ;;  %v409_v61 = vld [vmem:[%s866_s8 + $0x1] sm:$0x1] }
 0x1dc   :  { %v268_v63 = vadd.f32 %v266_v62, %v204_v46  ;;  %vm472_vm8 = vcmp.lt.s32.totalorder %v471_v60, 16 }
 0x1de   :  { %v269_v0 = vmax.f32 %v268_v63, 0.0 }
 0x1e0   :  { %504 = vmatmul.msk.f32.vlgmr.msra.gmra.mxu3 %vm166_vm1, %v269_v0 }
 0x263   :  { %v300_v5 = vpop.f32.mrf.mxu3 }
 0x264   :  { %v301_v6 = vadd.f32 %v525_v4, %v300_v5 }
 0x266   :  { %v303_v7 = vmax.f32 %v301_v6, 0.0 }
 0x268   :  { %505 = vmatmul.msk.f32.vlgmr.msrb.gmra.mxu0 %vm166_vm1, %v303_v7 }
 0x2e5   :  { %v334_v14 = vpop.f32.mrf.mxu0 }
 0x2e6   :  { %v335_v15 = vadd.f32 %v526_v13, %v334_v14 }
 0x2e8   :  { %v337_v16 = vadd.f32 %v335_v15, %v269_v0 }
 0x2ea   :  { %v338_v17 = vmax.f32 %v337_v16, 0.0 }
 0x2ec   :  { %507 = vmatmul.msk.f32.vlgmr.msrb.gmra.mxu1 %vm166_vm1, %v338_v17 }
 0x369   :  { %v369_v22 = vpop.f32.mrf.mxu1 }
 0x36a   :  { %v370_v23 = vadd.f32 %v527_v21, %v369_v22 }
 0x36c   :  { %v372_v24 = vmax.f32 %v370_v23, 0.0 }
 0x36e   :  { %508 = vmatmul.msk.f32.vlgmr.msrb.gmra.mxu2 %vm166_vm1, %v372_v24 }
 0x3f1   :  { %v403_v29 = vpop.f32.mrf.mxu2 }
 0x3f2   :  { %v404_v30 = vadd.f32 %v528_v28, %v403_v29 }
 0x3f4   :  { %v406_v31 = vadd.f32 %v404_v30, %v338_v17 }
 0x3f6   :  { %v407_v32 = vmax.f32 %v406_v31, 0.0 }
 0x3f8   :  { %509 = vmatmul.msk.f32.vlgmr.msrb.gmra.mxu3 %vm166_vm1, %v407_v32 }
 0x47b   :  { %v436_v34 = vpop.f32.mrf.mxu3 }
 0x47c   :  { %v437_v35 = vadd.f32 %v529_v33, %v436_v34 }
 0x47e   :  { %v439_v36 = vrot.slane %v437_v35, 4  ;;  %v445_v37 = vmul.f32 %v437_v35, %v437_v35 }
 0x480   :  { %v440_v38 = vadd.f32 %v439_v36, %v437_v35  ;;  %v446_v39 = vrot.slane %v445_v37, 4 }
 0x482   :  { %v441_v40 = vrot.slane %v440_v38, 2  ;;  %v447_v41 = vadd.f32 %v446_v39, %v445_v37 }
 0x484   :  { %v442_v42 = vadd.f32 %v441_v40, %v440_v38  ;;  %v448_v43 = vrot.slane %v447_v41, 2 }
 0x486   :  { %v443_v44 = vrot.slane %v442_v42, 1  ;;  %v449_v45 = vadd.f32 %v448_v43, %v447_v41 }
 0x488   :  { %v444_v46 = vadd.f32 %v443_v44, %v442_v42  ;;  %v450_v47 = vrot.slane %v449_v45, 1 }
 0x48a   :  { %v451_v48 = vadd.f32 %v450_v47, %v449_v45  ;;  %v452_v49 = vmul.f32 0.125, %v444_v46 }
 0x48c   :  { %v453_v50 = vmul.f32 0.125, %v451_v48  ;;  %v454_v51 = vmul.f32 %v452_v49, %v452_v49 }
 0x48e   :  { %v455_v52 = vsub.f32 %v453_v50, %v454_v51 }
 0x490   :  { %v456_v53 = vadd.f32 1e-05, %v455_v52 }
 0x492   :  { %532 = vrsqrt.f32 %v456_v53  ;;  %vm463_vm6 = vweird.f32 %v456_v53 }
 0x498   :  { %v533_v54 = vpop.eup %532 }
 0x499   :  { %v458_v55 = vmul.f32 %v533_v54, %v456_v53  ;;  %vm464_vm5 = vweird.f32 %v533_v54 }
 0x49a   :  { %vm465_vm7 = vmor %vm463_vm6, %vm464_vm5 }
 0x49b   :  { %v459_v56 = vmul.f32 %v533_v54, %v458_v55 }
 0x49d   :  { %v460_v58 = vmul.f32 0.5, %v459_v56 }
 0x49f   :  { %v461_v59 = vsub.f32 1.5, %v460_v58 }
 0x4a1   :  { %v462_v62 = vmul.f32 %v533_v54, %v461_v59 }
 0x4a3   :  { %v466_v63 = vsel %vm465_vm7, %v533_v54, %v462_v62 }
 0x4a4   :  { %v467_v0 = vmul.f32 %v466_v63, %v409_v61 }
 0x4a6   :  { %v468_v2 = vmul.f32 %v467_v0, %v452_v49  ;;  %v473_v3 = vsel %vm472_vm8, %v467_v0, 1.0 }
 0x4a7   :  { %v475_v4 = vperm.slane %v473_v3, 0 }
 0x4a8   :  { %v469_v5 = vsub.f32 %v410_v1, %v468_v2 }
 0x4a9   :  { %v476_v7 = vmul.f32 %v475_v4, %v437_v35 }
 0x4aa   :  { %v474_v6 = vsel %vm472_vm8, %v469_v5, 0.0 }
 0x4ab   :  { %v477_v8 = vperm.slane %v474_v6, 0 }
 0x4ad   :  { %v478_v9 = vadd.f32 %v477_v8, %v476_v7 }
 0x4af   :  { %479 = vst [vmem:[#allocation14] sm:$0xff] %v478_v9 }
 0x4b0   :  { %490 = dma.vmem_to_hbm [thread:$0]  %s486_s30, 128, %s488_s12, [#allocation4]  }
 0x4b1   :  { %734 = dma.done.wait [#allocation4], 128  }
 0x4b2   :  { %735 = vsyncadd [#allocation4], 4294967168 }
 0x4b3   :  { %495 = vsyncpa [#allocation3], 1 }
 0x4b4   :  { %496 = vsyncpa [#allocation6], 1 }
 0x4b5   :  { %497 = vsyncpa [#allocation9], 1 }
 0x4b6   :  { %498 = vsyncpa [#allocation12], 1 }
 0x4b7   :  { %499 = vsyncpa [#allocation4], 1 }

</bundles_post_ra>
